<compile_context>
chip_gen: v7x
topology: tpu7x:2x2x1
jax: 0.10.0
libtpu: 0.0.40
codegen_flags: <defaults>
</compile_context>

<pallas_src>
import math

import jax
import jax.numpy as jnp
from jax.experimental import pallas as pl
from jax.experimental.pallas import tpu as pltpu


def _const_kernel(c_ref, o_ref):
    # c_ref: (1, tp)  VMEM tile of the (flattened, lane-padded) constant
    # o_ref: (bn, tp) output tile covering `bn` batch rows
    # DMA-bound kernel: the broadcast cost is hidden under the output DMAs.
    o_ref[...] = jnp.broadcast_to(c_ref[...], o_ref.shape)


def _pick_tiles(n, p, dtype_bytes, target_bytes):
    """Choose (batch_tile, lane_tile) with bn*tp*dtype_bytes <= target_bytes,
    legal for (8, 128) tiling.  `p` must already be a multiple of 128 (or the
    full padded extent)."""
    # Lane (last-dim) tile: full extent if it fits, else a 128-aligned chunk.
    if p * dtype_bytes <= target_bytes:
        tp = p
    else:
        tp = max(128, (target_bytes // dtype_bytes // 128) * 128)
        tp = min(tp, p)
    # Batch (sublane) tile: full extent, or a multiple of 8.
    bn = max(1, target_bytes // max(tp * dtype_bytes, 1))
    if bn >= n:
        bn = n
    else:
        bn = min(max(8, (bn // 8) * 8), n)
        # Re-shrink tp so the (bn, tp) block stays within budget (fixes the
        # 8 x 4 MiB = 32 MiB VMEM blowup for constants larger than the budget).
        if bn * tp * dtype_bytes > target_bytes:
            tp = max(128, (target_bytes // (bn * dtype_bytes) // 128) * 128)
            tp = min(tp, p)
    return bn, tp


def const_forward(const, n, *, target_bytes=8 * 1024 * 1024,
                  pallas_min_bytes=256 * 1024):
    """Pallas implementation of torchelie Const.forward.

    Args:
      const: jnp array of shape (1, *size) — the learned constant volume.
      n: int batch size, or an array whose leading dimension gives the batch.
      target_bytes: per-block output budget (~8 MiB works across v5e/v6e/v7x).
      pallas_min_bytes: below this output size, fall back to XLA broadcast.
    Returns:
      Array of shape (n, *size): the constant broadcast (materialized) over n.
    """
    if hasattr(n, "shape"):
        n = n.shape[0]
    n = int(n)

    size = tuple(const.shape[1:])
    p = int(math.prod(size)) if size else 1
    dtype_bytes = jnp.dtype(const.dtype).itemsize

    # Tiny outputs: pallas_call launch/pipeline overhead dwarfs the copy.
    if n * p * dtype_bytes < pallas_min_bytes:
        return jnp.broadcast_to(const, (n,) + size)

    flat = const.reshape(1, p)

    # Pad the lane axis to a multiple of 128 so stores are unmasked `vst`.
    p_pad = max(128, ((p + 127) // 128) * 128)
    if p_pad != p:
        flat = jnp.pad(flat, ((0, 0), (0, p_pad - p)))

    bn, tp = _pick_tiles(n, p_pad, dtype_bytes, target_bytes)

    # Batch axis INNERMOST so the const tile (index (0, j)) stays resident in
    # VMEM across all batch tiles and is fetched only ceil(p_pad/tp) times.
    grid = (pl.cdiv(p_pad, tp), pl.cdiv(n, bn))

    # Computed VMEM limit: double-buffered output block + const block + headroom.
    need = 2 * (bn + 1) * tp * dtype_bytes
    vmem_limit = int(min(max(need + 4 * 1024 * 1024, 16 * 1024 * 1024),
                         48 * 1024 * 1024))

    out_flat = pl.pallas_call(
        _const_kernel,
        out_shape=jax.ShapeDtypeStruct((n, p_pad), const.dtype),
        grid=grid,
        in_specs=[pl.BlockSpec((1, tp), lambda j, i: (0, j))],
        out_specs=pl.BlockSpec((bn, tp), lambda j, i: (i, j)),
        compiler_params=pltpu.CompilerParams(
            dimension_semantics=("parallel", "parallel"),
            vmem_limit_bytes=vmem_limit,
        ),
    )(flat)

    if p_pad != p:
        out_flat = out_flat[:, :p]
    return out_flat.reshape((n,) + size)


def _reference(const, n):
    if hasattr(n, "shape"):
        n = n.shape[0]
    n = int(n)
    return jnp.broadcast_to(const, (n,) + tuple(const.shape[1:]))


if __name__ == "__main__":
    k0, k1, k2 = jax.random.split(jax.random.PRNGKey(0), 3)

    # Module-consistent small shape: Const(4, 16, 16), batch 2.
    size = (4, 16, 16)
    const = jax.random.normal(k0, (1,) + size, dtype=jnp.float32)

    # 1) int n, default path (tiny output -> XLA broadcast short-circuit).
    out = jax.block_until_ready(const_forward(const, 2))
    assert out.shape == (2,) + size, out.shape
    assert jnp.array_equal(out, _reference(const, 2)), "mismatch (short-circuit)"

    # 2) int n, Pallas path forced at the small shape (exercises the kernel).
    out_p = jax.block_until_ready(const_forward(const, 2, pallas_min_bytes=0))
    assert out_p.shape == (2,) + size, out_p.shape
    assert jnp.array_equal(out_p, _reference(const, 2)), "mismatch (pallas, int n)"

    # 3) n given as a tensor -> use its leading dimension (batch=3).
    dummy = jnp.zeros((3, 7), dtype=jnp.float32)
    out_t = jax.block_until_ready(const_forward(const, dummy, pallas_min_bytes=0))
    assert out_t.shape == (3,) + size, out_t.shape
    assert jnp.array_equal(out_t, _reference(const, dummy)), "mismatch (tensor n)"

    # 4) lane-unaligned volume (P = 3*5*7 = 105) -> exercises the padded path.
    size_u = (3, 5, 7)
    const_u = jax.random.normal(k1, (1,) + size_u, dtype=jnp.float32)
    out_u = jax.block_until_ready(const_forward(const_u, 4, pallas_min_bytes=0))
    assert out_u.shape == (4,) + size_u, out_u.shape
    assert jnp.array_equal(out_u, _reference(const_u, 4)), "mismatch (unaligned P)"

    # 5) big enough to take the Pallas path by default (512 KiB output).
    size_m = (8, 32, 32)
    const_m = jax.random.normal(k2, (1,) + size_m, dtype=jnp.float32)
    out_m = jax.block_until_ready(const_forward(const_m, 16))
    assert out_m.shape == (16,) + size_m, out_m.shape
    assert jnp.array_equal(out_m, _reference(const_m, 16)), "mismatch (default pallas)"

    print("KERNEL_OK")
</pallas_src>

<mosaic_0001>
module attributes {stable_mosaic.version = 11 : i64} {
  func.func @_const_kernel(%arg0: i32, %arg1: i32, %arg2: memref<1x1024xf32, #tpu.memory_space<vmem>>, %arg3: memref<2x1024xf32, #tpu.memory_space<vmem>>) attributes {dimension_semantics = [#tpu.dimension_semantics<parallel>, #tpu.dimension_semantics<parallel>], iteration_bounds = array<i64: 1, 1>, scalar_prefetch = 0 : i64, scratch_operands = 0 : i64, tpu.core_type = #tpu.core_type<tc>, window_params = [{transform_indices = @transform_0, window_bounds = array<i64: 1, 1024>}, {transform_indices = @transform_1, window_bounds = array<i64: 2, 1024>}]} {
    %c0 = arith.constant 0 : index
    %c0_0 = arith.constant 0 : index
    %0 = vector.load %arg2[%c0, %c0_0] : memref<1x1024xf32, #tpu.memory_space<vmem>>, vector<1x1024xf32>
    %1 = vector.shape_cast %0 : vector<1x1024xf32> to vector<1x1024xf32>
    %2 = vector.broadcast %1 : vector<1x1024xf32> to vector<2x1024xf32>
    %c0_1 = arith.constant 0 : index
    %c0_2 = arith.constant 0 : index
    %3 = vector.load %arg3[%c0_1, %c0_2] : memref<2x1024xf32, #tpu.memory_space<vmem>>, vector<2x1024xf32>
    tpu.vector_store %arg3[%c0_1, %c0_2], %2 {strides = array<i32>} : memref<2x1024xf32, #tpu.memory_space<vmem>>, vector<2x1024xf32>,
    return
  }
  func.func @transform_0(%arg0: i32, %arg1: i32) -> (i32, i32) {
    %c0_i32 = arith.constant 0 : i32
    %c0_i32_0 = arith.constant 0 : i32
    return %c0_i32, %arg0 : i32, i32
  }
  func.func @transform_1(%arg0: i32, %arg1: i32) -> (i32, i32) {
    %c0_i32 = arith.constant 0 : i32
    return %arg1, %arg0 : i32, i32
  }
}

</mosaic_0001>

<bundles_post_ra>
// kernel: tpu_custom_call.1
= control target key start
LH: loop header
LB: loop body
LE: loop exit
PB: predicated region body
PF: predicated region fallthrough
CT: control target
= control target key end

     0   :  { %6 = vsyncpa [#allocation3], 0  ;;  %s196_s0 = inlined_call_operand.hbm [shape: f32[1,1024], index: 0, kind: input, shape index: {}]   ;;  %s197_s1 = inlined_call_operand.hbm [shape: f32[2,1024], index: 1, kind: output, shape index: {}]  }
   0x1   :  { %7 = vsyncpa [#allocation4], 0  ;;  %s159_s6 = smov [#allocation2]   ;;  %s111_s10 = scalar_lea.hbm %s196_s0, 128 }
   0x2   :  { %s14_s7 = sshll.u32 %s159_s6, 4  ;;  %p112_p0 = scmp.ne.s32.totalorder %s196_s0, %s111_s10  ;;  %s15_s7 = int_to_ptr.vmem [resolvable:$true] %s14_s7 }
   0x3   :  { %p115_p1 = scmp.lt.u32.totalorder %s111_s10, %s196_s0 }
   0x5   :  { %p117_p2 = pnand %p115_p1, %p112_p0 }
   0x7   :  { %120 = shalt.err (!%p117_p2)
}
   0x8   :  { %s121_s15 = scalar_lea.vmem %s15_s7, 128  ;;  %p126_p4 = scmp.lt.s32.totalorder %s15_s7, %s15_s7 }
   0x9   :  { %p122_p3 = scmp.ne.s32.totalorder %s15_s7, %s121_s15  ;;  %p127_p5 = scmp.lt.s32.totalorder %s121_s15, %s121_s15 }
   0xb   :  { %p128_p6 = por %p127_p5, %p126_p4 }
   0xd   :  { %p129_p7 = pnand %p128_p6, %p122_p3 }
   0xf   :  { %132 = shalt.err (!%p129_p7)
}
  0x10   :  { %17 = dma.hbm_to_vmem [thread:$0]  %s196_s0, 128, %s15_s7, [#allocation3]  }
  0x11   :  { %155 = dma.done.wait [#allocation3], 128  }
  0x12   :  { %156 = vsyncadd [#allocation3], 4294967168  ;;  %v23_v0 = vlaneseq  ;;  %v160_v1 = vmov 1983009808   ;;  %v21_v13 = vld [vmem:[#allocation2] sm:$0xff]  ;;  %s161_s0 = smov [#allocation5]  }
  0x13   :  { %v58_v2 = vunpack.c.l.s4 %v160_v1  ;;  %s99_s18 = sshll.u32 %s161_s0, 4  ;;  %s100_s18 = int_to_ptr.vmem [resolvable:$true] %s99_s18 }
  0x14   :  { %v24_v3 = vshrl.u32 %v23_v0, 7  ;;  %s133_s19 = scalar_lea.vmem %s100_s18, 256  ;;  %p138_p9 = scmp.lt.s32.totalorder %s100_s18, %s100_s18 }
  0x15   :  { %v59_v4 = vunpack.c.0.s8 %v58_v2  ;;  %p134_p8 = scmp.ne.s32.totalorder %s100_s18, %s133_s19  ;;  %p139_p10 = scmp.lt.s32.totalorder %s133_s19, %s133_s19 }
  0x16   :  { %v25_v5 = vsub.s32 0, %v24_v3  ;;  %v29_v6 = vsub.s32 1, %v24_v3  ;;  %v33_v7 = vsub.s32 2, %v24_v3  ;;  %v37_v8 = vsub.s32 3, %v24_v3 }
  0x17   :  { %v41_v9 = vsub.s32 4, %v24_v3  ;;  %v45_v10 = vsub.s32 5, %v24_v3  ;;  %v49_v11 = vsub.s32 6, %v24_v3  ;;  %v53_v12 = vsub.s32 7, %v24_v3  ;;  %p140_p11 = por %p139_p10, %p138_p9 }
  0x18   :  { %v62_v14 = vsub.s32 %v59_v4, %v24_v3  ;;  %v26_v15 = vrot.slane %v21_v13, %v25_v5  ;;  %v30_v16 = vrot.slane %v21_v13, %v29_v6  ;;  %v34_v17 = vrot.slane %v21_v13, %v33_v7 }
  0x19   :  { %v38_v18 = vrot.slane %v21_v13, %v37_v8  ;;  %v42_v19 = vrot.slane %v21_v13, %v41_v9  ;;  %v46_v20 = vrot.slane %v21_v13, %v45_v10  ;;  %v50_v21 = vrot.slane %v21_v13, %v49_v11  ;;  %p141_p12 = pnand %p140_p11, %p134_p8 }
  0x1a   :  { %v54_v22 = vrot.slane %v21_v13, %v53_v12  ;;  %v55_v23 = vcombine.low %v26_v15, %v30_v16 }
  0x1b   :  { %v56_v24 = vcombine.low %v34_v17, %v38_v18  ;;  %v72_v25 = vcombine.low %v42_v19, %v46_v20 }
  0x1c   :  { %v73_v26 = vcombine.low %v50_v21, %v54_v22  ;;  %v63_v27 = vrot.slane %v55_v23, %v62_v14 }
  0x1d   :  { %v70_v28 = vrot.slane %v56_v24, %v62_v14  ;;  %v80_v29 = vrot.slane %v72_v25, %v62_v14 }
  0x1e   :  { %v87_v30 = vrot.slane %v73_v26, %v62_v14 }
  0x1f   :  { %v71_v31 = vcombine.low %v63_v27, %v70_v28 }
  0x20   :  { %v88_v32 = vcombine.low %v80_v29, %v87_v30 }
  0x21   :  { %91 = vst [vmem:[#allocation5] sm:$0xff] %v71_v31 }
  0x22   :  { %92 = vst [vmem:[#allocation5 + $0x8] sm:$0xff] %v88_v32 }
  0x23   :  { %144 = shalt.err (!%p141_p12)
}
  0x24   :  { %s145_s22 = scalar_lea.hbm %s197_s1, 256 }
  0x25   :  { %p146_p13 = scmp.ne.s32.totalorder %s197_s1, %s145_s22  ;;  %p149_p0 = scmp.lt.u32.totalorder %s145_s22, %s197_s1 }
  0x27   :  { %p151_p1 = pnand %p149_p0, %p146_p13 }
  0x29   :  { %154 = shalt.err (!%p151_p1)
}
  0x2a   :  { %102 = dma.vmem_to_hbm [thread:$0]  %s100_s18, 256, %s197_s1, [#allocation4]  }
  0x2b   :  { %157 = dma.done.wait [#allocation4], 256  }
  0x2c   :  { %158 = vsyncadd [#allocation4], 4294967040 }
  0x2d   :  { %106 = vsyncpa [#allocation3], 1 }
  0x2e   :  { %107 = vsyncpa [#allocation4], 1 }

</bundles_post_ra>
